<compile_context>
chip_gen: v7x
topology: tpu7x:2x2x1
jax: 0.10.0
libtpu: 0.0.40
codegen_flags: <defaults>
</compile_context>

<pallas_src>
import jax
import jax.numpy as jnp
from jax.experimental import pallas as pl
from jax.experimental.pallas import tpu as pltpu

# ---- synthetic "config" values (mirroring config.* used in the module) ----
NUM_DROP = 5                   # config.num_drop
HIDDEN_DROPOUT_PROB = 0.1      # config.hidden_dropout_prob
INCREMENT_DROPOUT_PROB = 0.1   # config.increment_dropout_prob
NUM_LABELS = 3                 # config.num_labels


def _round_up(x, m):
    return ((x + m - 1) // m) * m


def dropcat_kernel(cat_ref, bits_ref, wt_ref, b_ref, out_ref):
    # cat_ref:  [TB, 4H]            CLS-token concat (already lane-dense)
    # bits_ref: [NUM_DROP, TB, 4H]  raw uint32 random bits, one slab per dropout head
    # wt_ref:   [4H, LPAD]          classifier weight, pre-transposed + lane-padded
    # b_ref:    [1, LPAD]           classifier bias, lane-padded
    # out_ref:  [TB, LPAD]
    cat = cat_ref[...]
    bits = bits_ref[...]

    # TODO(synk): StableDropout's context-stack / mask-reuse behavior is not modeled;
    # standard inverted Bernoulli dropout is used for each head.
    #
    # Exploit linearity of the classifier: sum_i W @ (cat * m_i) / N == W @ (cat * m_eff)
    # with m_eff = sum_i m_i / N, where m_i = bernoulli(keep_i) / keep_i.
    m_eff = jnp.zeros_like(cat)
    for i in range(NUM_DROP):
        p = HIDDEN_DROPOUT_PROB + INCREMENT_DROPOUT_PROB * i
        keep = 1.0 - p
        # integer threshold: P(bits < keep * 2^32) == keep
        thr = jnp.uint32(min(int(round(keep * (1 << 32))), (1 << 32) - 1))
        scale = jnp.float32((1.0 / keep) * (1.0 / NUM_DROP))
        m_eff = m_eff + jnp.where(bits[i] < thr, scale, jnp.float32(0.0))

    # single MXU pass: [TB, 4H] @ [4H, LPAD] + [1, LPAD]
    out_ref[...] = (
        jnp.dot(cat * m_eff, wt_ref[...], preferred_element_type=jnp.float32)
        + b_ref[...]
    )


def drop_cat_forward(key, h1, h2, h3, h4, w, b):
    """key: jax PRNG key for the dropout masks; h*: [B, S, H] hidden states
    (last 4 encoder layers); w: [L, 4H] (PyTorch Linear layout); b: [L]."""
    B, S, H = h1.shape
    L = w.shape[0]
    F = 4 * H

    # CLS slice + concat in the wrapper -> one lane-dense [B, 4H] slab.
    cat = jnp.concatenate(
        [h1[:, 0, :], h2[:, 0, :], h3[:, 0, :], h4[:, 0, :]], axis=-1
    ).astype(jnp.float32)

    # Pad batch to a multiple of the batch tile and labels to a full 128-lane slab.
    B_pad = _round_up(B, 8)
    TB = B_pad if B_pad <= 128 else 128
    B_pad = _round_up(B_pad, TB)
    LPAD = max(128, _round_up(L, 128))

    if B_pad != B:
        cat = jnp.pad(cat, ((0, B_pad - B), (0, 0)))

    wt = jnp.zeros((F, LPAD), jnp.float32).at[:, :L].set(w.T.astype(jnp.float32))
    b2 = jnp.zeros((1, LPAD), jnp.float32).at[:, :L].set(b.astype(jnp.float32))

    # One draw of all dropout bits (uint32), one slab per dropout head.
    bits = jax.random.bits(key, (NUM_DROP, B_pad, F), dtype=jnp.uint32)

    grid = (B_pad // TB,)
    out = pl.pallas_call(
        dropcat_kernel,
        out_shape=jax.ShapeDtypeStruct((B_pad, LPAD), jnp.float32),
        grid=grid,
        in_specs=[
            pl.BlockSpec((TB, F), lambda i: (i, 0)),
            pl.BlockSpec((NUM_DROP, TB, F), lambda i: (0, i, 0)),
            pl.BlockSpec((F, LPAD), lambda i: (0, 0)),
            pl.BlockSpec((1, LPAD), lambda i: (0, 0)),
        ],
        out_specs=pl.BlockSpec((TB, LPAD), lambda i: (i, 0)),
        compiler_params=pltpu.CompilerParams(
            dimension_semantics=("parallel",),
        ),
    )(cat, bits, wt, b2)

    return out[:B, :L]


if __name__ == "__main__":
    # Small BERT-like shapes: batch=2, seq=8, hidden=32 -> concat feature dim = 4*32 = 128.
    B, S, H = 2, 8, 32

    key = jax.random.PRNGKey(0)
    k1, k2, k3, k4, kw, kb, kdrop = jax.random.split(key, 7)

    # Simulated last-4 hidden-state layers of the encoder (outputs[2][-1] ... outputs[2][-4]).
    h_last1 = jax.random.normal(k1, (B, S, H), jnp.float32)
    h_last2 = jax.random.normal(k2, (B, S, H), jnp.float32)
    h_last3 = jax.random.normal(k3, (B, S, H), jnp.float32)
    h_last4 = jax.random.normal(k4, (B, S, H), jnp.float32)

    # Classifier params: nn.Linear(4*H, num_labels) -> weight [L, 4H], bias [L].
    w = 0.02 * jax.random.normal(kw, (NUM_LABELS, 4 * H), jnp.float32)
    b = 0.02 * jax.random.normal(kb, (NUM_LABELS,), jnp.float32)

    fwd = jax.jit(drop_cat_forward)
    out = fwd(kdrop, h_last1, h_last2, h_last3, h_last4, w, b)
    jax.block_until_ready(out)

    assert out.shape == (B, NUM_LABELS) and out.dtype == jnp.float32
    assert bool(jnp.all(jnp.isfinite(out)))
    print("KERNEL_OK")
</pallas_src>

<mosaic_0001>
module attributes {stable_mosaic.version = 11 : i64} {
  func.func @dropcat_kernel(%arg0: i32, %arg1: memref<8x128xf32, #tpu.memory_space<vmem>>, %arg2: memref<5x8x128xi32, #tpu.memory_space<vmem>>, %arg3: memref<128x128xf32, #tpu.memory_space<vmem>>, %arg4: memref<1x128xf32, #tpu.memory_space<vmem>>, %arg5: memref<8x128xf32, #tpu.memory_space<vmem>>) attributes {dimension_semantics = [#tpu.dimension_semantics<parallel>], iteration_bounds = array<i64: 1>, scalar_prefetch = 0 : i64, scratch_operands = 0 : i64, tpu.core_type = #tpu.core_type<tc>, window_params = [{transform_indices = @transform_0, window_bounds = array<i64: 8, 128>}, {transform_indices = @transform_1, window_bounds = array<i64: 5, 8, 128>}, {pipeline_mode = #tpu.pipeline_mode<synchronous>, transform_indices = @transform_2, window_bounds = array<i64: 128, 128>}, {pipeline_mode = #tpu.pipeline_mode<synchronous>, transform_indices = @transform_3, window_bounds = array<i64: 1, 128>}, {transform_indices = @transform_4, window_bounds = array<i64: 8, 128>}]} {
    %c0 = arith.constant 0 : index
    %c0_0 = arith.constant 0 : index
    %0 = vector.load %arg1[%c0, %c0_0] : memref<8x128xf32, #tpu.memory_space<vmem>>, vector<8x128xf32>
    %c0_1 = arith.constant 0 : index
    %c0_2 = arith.constant 0 : index
    %c0_3 = arith.constant 0 : index
    %1 = vector.load %arg2[%c0_1, %c0_2, %c0_3] : memref<5x8x128xi32, #tpu.memory_space<vmem>>, vector<5x8x128xi32>
    %cst = arith.constant 0.000000e+00 : f32
    %2 = vector.broadcast %cst : f32 to vector<8x128xf32>
    %3 = vector.extract_strided_slice %1 {offsets = [0, 0, 0], sizes = [1, 8, 128], strides = [1, 1, 1]} : vector<5x8x128xi32> to vector<1x8x128xi32>
    %4 = vector.shape_cast %3 : vector<1x8x128xi32> to vector<8x128xi32>
    %c-429496730_i32 = arith.constant -429496730 : i32
    %5 = vector.broadcast %c-429496730_i32 : i32 to vector<8x128xi32>
    %6 = arith.cmpi ult, %4, %5 : vector<8x128xi32>
    %cst_4 = arith.constant 0.222222224 : f32
    %cst_5 = arith.constant 0.000000e+00 : f32
    %7 = vector.broadcast %cst_4 : f32 to vector<8x128xf32>
    %8 = vector.broadcast %cst_5 : f32 to vector<8x128xf32>
    %9 = arith.select %6, %7, %8 : vector<8x128xi1>, vector<8x128xf32>
    %10 = arith.addf %2, %9 : vector<8x128xf32>
    %11 = vector.extract_strided_slice %1 {offsets = [1, 0, 0], sizes = [1, 8, 128], strides = [1, 1, 1]} : vector<5x8x128xi32> to vector<1x8x128xi32>
    %12 = vector.shape_cast %11 : vector<1x8x128xi32> to vector<8x128xi32>
    %c-858993459_i32 = arith.constant -858993459 : i32
    %13 = vector.broadcast %c-858993459_i32 : i32 to vector<8x128xi32>
    %14 = arith.cmpi ult, %12, %13 : vector<8x128xi32>
    %cst_6 = arith.constant 2.500000e-01 : f32
    %cst_7 = arith.constant 0.000000e+00 : f32
    %15 = vector.broadcast %cst_6 : f32 to vector<8x128xf32>
    %16 = vector.broadcast %cst_7 : f32 to vector<8x128xf32>
    %17 = arith.select %14, %15, %16 : vector<8x128xi1>, vector<8x128xf32>
    %18 = arith.addf %10, %17 : vector<8x128xf32>
    %19 = vector.extract_strided_slice %1 {offsets = [2, 0, 0], sizes = [1, 8, 128], strides = [1, 1, 1]} : vector<5x8x128xi32> to vector<1x8x128xi32>
    %20 = vector.shape_cast %19 : vector<1x8x128xi32> to vector<8x128xi32>
    %c-1288490189_i32 = arith.constant -1288490189 : i32
    %21 = vector.broadcast %c-1288490189_i32 : i32 to vector<8x128xi32>
    %22 = arith.cmpi ult, %20, %21 : vector<8x128xi32>
    %cst_8 = arith.constant 0.285714298 : f32
    %cst_9 = arith.constant 0.000000e+00 : f32
    %23 = vector.broadcast %cst_8 : f32 to vector<8x128xf32>
    %24 = vector.broadcast %cst_9 : f32 to vector<8x128xf32>
    %25 = arith.select %22, %23, %24 : vector<8x128xi1>, vector<8x128xf32>
    %26 = arith.addf %18, %25 : vector<8x128xf32>
    %27 = vector.extract_strided_slice %1 {offsets = [3, 0, 0], sizes = [1, 8, 128], strides = [1, 1, 1]} : vector<5x8x128xi32> to vector<1x8x128xi32>
    %28 = vector.shape_cast %27 : vector<1x8x128xi32> to vector<8x128xi32>
    %c-1717986918_i32 = arith.constant -1717986918 : i32
    %29 = vector.broadcast %c-1717986918_i32 : i32 to vector<8x128xi32>
    %30 = arith.cmpi ult, %28, %29 : vector<8x128xi32>
    %cst_10 = arith.constant 0.333333343 : f32
    %cst_11 = arith.constant 0.000000e+00 : f32
    %31 = vector.broadcast %cst_10 : f32 to vector<8x128xf32>
    %32 = vector.broadcast %cst_11 : f32 to vector<8x128xf32>
    %33 = arith.select %30, %31, %32 : vector<8x128xi1>, vector<8x128xf32>
    %34 = arith.addf %26, %33 : vector<8x128xf32>
    %35 = vector.extract_strided_slice %1 {offsets = [4, 0, 0], sizes = [1, 8, 128], strides = [1, 1, 1]} : vector<5x8x128xi32> to vector<1x8x128xi32>
    %36 = vector.shape_cast %35 : vector<1x8x128xi32> to vector<8x128xi32>
    %c-2147483648_i32 = arith.constant -2147483648 : i32
    %37 = vector.broadcast %c-2147483648_i32 : i32 to vector<8x128xi32>
    %38 = arith.cmpi ult, %36, %37 : vector<8x128xi32>
    %cst_12 = arith.constant 4.000000e-01 : f32
    %cst_13 = arith.constant 0.000000e+00 : f32
    %39 = vector.broadcast %cst_12 : f32 to vector<8x128xf32>
    %40 = vector.broadcast %cst_13 : f32 to vector<8x128xf32>
    %41 = arith.select %38, %39, %40 : vector<8x128xi1>, vector<8x128xf32>
    %42 = arith.addf %34, %41 : vector<8x128xf32>
    %43 = arith.mulf %0, %42 : vector<8x128xf32>
    %c0_14 = arith.constant 0 : index
    %c0_15 = arith.constant 0 : index
    %44 = vector.load %arg3[%c0_14, %c0_15] : memref<128x128xf32, #tpu.memory_space<vmem>>, vector<128x128xf32>
    %cst_16 = arith.constant dense<0.000000e+00> : vector<8x128xf32>
    %45 = tpu.matmul %43, %44, %cst_16 {dimension_numbers = #tpu.dot_dimension_numbers<[1], [0], [0], [1], [0, 0, 1, 1], [], []>} : vector<8x128xf32>, vector<128x128xf32>, vector<8x128xf32> -> vector<8x128xf32>
    %c0_17 = arith.constant 0 : index
    %c0_18 = arith.constant 0 : index
    %46 = vector.load %arg4[%c0_17, %c0_18] : memref<1x128xf32, #tpu.memory_space<vmem>>, vector<1x128xf32>
    %47 = vector.broadcast %46 : vector<1x128xf32> to vector<8x128xf32>
    %48 = arith.addf %45, %47 : vector<8x128xf32>
    %c0_19 = arith.constant 0 : index
    %c0_20 = arith.constant 0 : index
    %49 = vector.load %arg5[%c0_19, %c0_20] : memref<8x128xf32, #tpu.memory_space<vmem>>, vector<8x128xf32>
    tpu.vector_store %arg5[%c0_19, %c0_20], %48 {strides = array<i32>} : memref<8x128xf32, #tpu.memory_space<vmem>>, vector<8x128xf32>,
    return
  }
  func.func @transform_0(%arg0: i32) -> (i32, i32) {
    %c0_i32 = arith.constant 0 : i32
    %c0_i32_0 = arith.constant 0 : i32
    return %arg0, %c0_i32 : i32, i32
  }
  func.func @transform_1(%arg0: i32) -> (i32, i32, i32) {
    %c0_i32 = arith.constant 0 : i32
    %c0_i32_0 = arith.constant 0 : i32
    %c0_i32_1 = arith.constant 0 : i32
    return %c0_i32, %arg0, %c0_i32_0 : i32, i32, i32
  }
  func.func @transform_2(%arg0: i32) -> (i32, i32) {
    %c0_i32 = arith.constant 0 : i32
    %c0_i32_0 = arith.constant 0 : i32
    %c0_i32_1 = arith.constant 0 : i32
    return %c0_i32, %c0_i32_0 : i32, i32
  }
  func.func @transform_3(%arg0: i32) -> (i32, i32) {
    %c0_i32 = arith.constant 0 : i32
    %c0_i32_0 = arith.constant 0 : i32
    %c0_i32_1 = arith.constant 0 : i32
    return %c0_i32, %c0_i32_0 : i32, i32
  }
  func.func @transform_4(%arg0: i32) -> (i32, i32) {
    %c0_i32 = arith.constant 0 : i32
    %c0_i32_0 = arith.constant 0 : i32
    return %arg0, %c0_i32 : i32, i32
  }
}

</mosaic_0001>

<bundles_post_ra>
// kernel: drop_cat_forward.1
= control target key start
LH: loop header
LB: loop body
LE: loop exit
PB: predicated region body
PF: predicated region fallthrough
CT: control target
= control target key end

     0   :  { %v217_v0 = vmov 0.0|0.0   ;;  %vm218_vm0 = vmmov 0   ;;  %v219_v4 = vmov 0.0   ;;  %s325_s2 = inlined_call_operand.vmem [shape: f32[128,128], index: 2, kind: input, shape index: {}]   ;;  %s326_s1 = inlined_call_operand.vmem [shape: u32[5,8,128], index: 1, kind: input, shape index: {}]   ;;  %s327_s0 = inlined_call_operand.vmem [shape: f32[8,128], index: 0, kind: input, shape index: {}]   ;;  %s328_s3 = inlined_call_operand.vmem [shape: f32[1,128], index: 3, kind: input, shape index: {}]   ;;  %s329_s4 = inlined_call_operand.vmem [shape: f32[8,128], index: 4, kind: output, shape index: {}]  }
   0x1   :  { %190 = vmatprep.subr.bf16.mxu0 %v217_v0  ;;  %v39_v1 = vld [vmem:[%s325_s2] sm:$0xff]  ;;  %v40_v2 = vld [vmem:[%s325_s2 + $0x8] sm:$0xff]  ;;  %v41_v3 = vld [vmem:[%s325_s2 + $0x10] sm:$0xff]  ;;  %187 = vmatprep.mubr.msk.f32.mxu0 %vm218_vm0, %v219_v4 }
   0x2   :  { %v191_v5 = vpack.c.bf16 %v40_v2, %v39_v1  ;;  %v42_v6 = vld [vmem:[%s325_s2 + $0x18] sm:$0xff]  ;;  %v43_v8 = vld [vmem:[%s325_s2 + $0x20] sm:$0xff]  ;;  %v44_v9 = vld [vmem:[%s325_s2 + $0x28] sm:$0xff] }
   0x3   :  { %v194_v7 = vpack.c.bf16 %v42_v6, %v41_v3  ;;  %v18_v10 = vld [vmem:[%s326_s1] sm:$0xff]  ;;  %v19_v11 = vld [vmem:[%s326_s1 + $0x8] sm:$0xff]  ;;  %v197_v12 = vpack.c.bf16 %v44_v9, %v43_v8  ;;  %v45_v13 = vld [vmem:[%s325_s2 + $0x30] sm:$0xff] }
   0x4   :  { %192 = vmatpush3.bf16.msra.mxu0 %v191_v5  ;;  %v46_v14 = vld [vmem:[%s325_s2 + $0x38] sm:$0xff]  ;;  %vm23_vm1 = vcmp.lt.u32.totalorder %v18_v10, 3865470566  ;;  %vm26_vm2 = vcmp.lt.u32.totalorder %v19_v11, 3435973837  ;;  %v20_v15 = vld [vmem:[%s326_s1 + $0x10] sm:$0xff] }
   0x5   :  { %193 = vmatprep.subr.bf16.mxu0 %v217_v0  ;;  %v200_v16 = vpack.c.bf16 %v46_v14, %v45_v13  ;;  %v24_v17 = vsel %vm23_vm1, 0.22222222, %v219_v4  ;;  %v27_v18 = vsel %vm26_vm2, 0.25, %v219_v4  ;;  %v47_v19 = vld [vmem:[%s325_s2 + $0x40] sm:$0xff]  ;;  %v48_v20 = vld [vmem:[%s325_s2 + $0x48] sm:$0xff]  ;;  %v21_v21 = vld [vmem:[%s326_s1 + $0x18] sm:$0xff] }
   0x6   :  { %vm29_vm3 = vcmp.lt.u32.totalorder %v20_v15, 3006477107  ;;  %v28_v22 = vadd.f32 %v27_v18, %v24_v17  ;;  %v203_v23 = vpack.c.bf16 %v48_v20, %v47_v19  ;;  %v49_v25 = vld [vmem:[%s325_s2 + $0x50] sm:$0xff]  ;;  %v50_v26 = vld [vmem:[%s325_s2 + $0x58] sm:$0xff]  ;;  %vm32_vm4 = vcmp.lt.u32.totalorder %v21_v21, 2576980378 }
   0x7   :  { %v30_v24 = vsel %vm29_vm3, 0.2857143, %v219_v4  ;;  %v22_v27 = vld [vmem:[%s326_s1 + $0x20] sm:$0xff]  ;;  %v206_v29 = vpack.c.bf16 %v50_v26, %v49_v25  ;;  %v33_v30 = vsel %vm32_vm4, 0.33333334, %v219_v4  ;;  %v52_v32 = vld [vmem:[%s325_s2 + $0x68] sm:$0xff] }
   0x8   :  { %195 = vmatpush3.bf16.msra.mxu0 %v194_v7  ;;  %v31_v28 = vadd.f32 %v30_v24, %v28_v22  ;;  %v51_v31 = vld [vmem:[%s325_s2 + $0x60] sm:$0xff]  ;;  %vm35_vm5 = vcmp.lt.u32.totalorder %v22_v27, 2147483648  ;;  %v53_v36 = vld [vmem:[%s325_s2 + $0x70] sm:$0xff]  ;;  %v54_v37 = vld [vmem:[%s325_s2 + $0x78] sm:$0xff] }
   0x9   :  { %196 = vmatprep.subr.bf16.mxu0 %v217_v0  ;;  %v209_v34 = vpack.c.bf16 %v52_v32, %v51_v31  ;;  %v36_v35 = vsel %vm35_vm5, 0.4, %v219_v4  ;;  %v212_v39 = vpack.c.bf16 %v54_v37, %v53_v36  ;;  %v17_v40 = vld [vmem:[%s327_s0] sm:$0xff] }
   0xa   :  { %v34_v33 = vadd.f32 %v33_v30, %v31_v28  ;;  %v137_v42 = vld [vmem:[%s328_s3] ss:$0 sm:$0xff] }
   0xc   :  { %198 = vmatpush3.bf16.msra.mxu0 %v197_v12  ;;  %v37_v38 = vadd.f32 %v36_v35, %v34_v33 }
   0xd   :  { %199 = vmatprep.subr.bf16.mxu0 %v217_v0 }
   0xe   :  { %v38_v41 = vmul.f32 %v37_v38, %v17_v40 }
  0x10   :  { %201 = vmatpush3.bf16.msra.mxu0 %v200_v16 }
  0x11   :  { %202 = vmatprep.subr.bf16.mxu0 %v217_v0 }
  0x14   :  { %204 = vmatpush3.bf16.msra.mxu0 %v203_v23 }
  0x15   :  { %205 = vmatprep.subr.bf16.mxu0 %v217_v0 }
  0x18   :  { %207 = vmatpush3.bf16.msra.mxu0 %v206_v29 }
  0x19   :  { %208 = vmatprep.subr.bf16.mxu0 %v217_v0 }
  0x1c   :  { %210 = vmatpush3.bf16.msra.mxu0 %v209_v34 }
  0x1d   :  { %211 = vmatprep.subr.bf16.mxu0 %v217_v0 }
  0x20   :  { %213 = vmatpush3.bf16.msra.mxu0 %v212_v39 }
  0x23   :  { %188 = vmatmul.mubr.f32.vlgmr.msra.gmra.mrb[0].mxu0 %v38_v41 }
  0xf6   :  { %v128_v43 = vpop.f32.mrb[0].mxu0 }
  0xf7   :  { %v129_v44 = vadd.f32 %v137_v42, %v128_v43  ;;  %v189_v45 = vpop.f32.mrb[1].mxu0 }
  0xf9   :  { %132 = vst [vmem:[%s329_s4] sm:$0xff] %v129_v44 }

</bundles_post_ra>
